<compile_context>
chip_gen: v7x
topology: tpu7x:2x2x1
jax: 0.10.0
libtpu: 0.0.40
codegen_flags: <defaults>
</compile_context>

<pallas_src>
import functools

import numpy as np
import jax
import jax.numpy as jnp
from jax.experimental import pallas as pl
from jax.experimental.pallas import tpu as pltpu

EPS = 1e-5
_PADT = 8  # top zero rows in the conv scratch (multiple of 8 -> aligned store)


# ----------------------------------------------------------------------------
# Kernel: [optional fused BN-affine + ReLU prologue] -> 3x3 same conv (+bias)
#         -> per-tile BN partial statistics.
#   x_ref     : (1, H, W*Cin)        lane-dense activation tile (one batch item)
#   scale_ref : (1, W*Cin)           BN scale of the *previous* conv, W-tiled
#   shift_ref : (1, W*Cin)           BN shift of the *previous* conv, W-tiled
#   w_ref     : (3*W*Cin, W*Cout)    W-banded, K-flattened conv weights
#   b_ref     : (1, W*Cout)          conv bias, W-tiled
#   y_ref     : (1, H, W*Cout)       conv output (lane-dense)
#   ssum_ref  : (1, 1, W*Cout)       per-tile sum over H        (BN partial)
#   ssq_ref   : (1, 1, W*Cout)       per-tile sum of squares    (BN partial)
#   xpad_ref  : (H + 2*_PADT, W*Cin) VMEM scratch for the zero H-halo
# ----------------------------------------------------------------------------
def _conv3x3_fused_kernel(x_ref, scale_ref, shift_ref, w_ref, b_ref,
                          y_ref, ssum_ref, ssq_ref, xpad_ref,
                          *, apply_bn_relu_prologue):
    H = x_ref.shape[1]
    WCout = b_ref.shape[-1]

    x2d = x_ref[0]                                            # (H, W*Cin)
    if apply_bn_relu_prologue:
        # BN of the previous conv + ReLU, fused as a lane-wise VPU prologue.
        x2d = jnp.maximum(x2d * scale_ref[...] + shift_ref[...], 0.0)

    # In-kernel halo: data stored at sublane offset _PADT (aligned, unmasked).
    # Rows above/below provide the zero padding in H; zero padding in W is
    # encoded in the banded weight matrix.
    xpad_ref[...] = jnp.zeros_like(xpad_ref)
    xpad_ref[_PADT:_PADT + H, :] = x2d
    xp = xpad_ref[...]

    # Single MXU matmul: the three H-shifted row views concatenated along the
    # contraction axis (K = 3*W*Cin) against the banded weights.
    slab = jnp.concatenate(
        [xp[_PADT - 1 + kh:_PADT - 1 + kh + H, :] for kh in range(3)], axis=-1)
    acc = jnp.dot(slab, w_ref[...], preferred_element_type=jnp.float32)
    acc = acc + b_ref[...]                                    # (H, W*Cout)

    y_ref[...] = acc.reshape(1, H, WCout)
    # BN batch-stat partials for THIS conv's output (reduced over H here,
    # over N and W on the host -- O(C) host work).
    ssum_ref[...] = jnp.sum(acc, axis=0, keepdims=True).reshape(1, 1, WCout)
    ssq_ref[...] = jnp.sum(acc * acc, axis=0, keepdims=True).reshape(1, 1, WCout)


# ----------------------------------------------------------------------------
# Kernel: final BatchNorm-affine + ReLU epilogue (pure lane-wise VPU).
# ----------------------------------------------------------------------------
def _bn_relu_kernel(x_ref, scale_ref, shift_ref, o_ref):
    o_ref[...] = jnp.maximum(x_ref[...] * scale_ref[...] + shift_ref[...], 0.0)


# ----------------------------------------------------------------------------
# pallas_call wrappers.
# ----------------------------------------------------------------------------
def _conv3x3_fused(x, scale_t, shift_t, w_banded, bias_t, *,
                   apply_bn_relu_prologue):
    N, H, WCin = x.shape
    WCout = w_banded.shape[-1]
    kernel = functools.partial(_conv3x3_fused_kernel,
                               apply_bn_relu_prologue=apply_bn_relu_prologue)
    flops = 2 * N * H * w_banded.shape[0] * WCout
    bytes_accessed = 4 * (x.size + scale_t.size + shift_t.size + w_banded.size
                          + bias_t.size + N * H * WCout + 2 * N * WCout)
    return pl.pallas_call(
        kernel,
        out_shape=(
            jax.ShapeDtypeStruct((N, H, WCout), jnp.float32),
            jax.ShapeDtypeStruct((N, 1, WCout), jnp.float32),
            jax.ShapeDtypeStruct((N, 1, WCout), jnp.float32),
        ),
        grid_spec=pltpu.PrefetchScalarGridSpec(
            num_scalar_prefetch=0,
            grid=(N,),
            in_specs=[
                pl.BlockSpec((1, H, WCin), lambda n: (n, 0, 0)),
                pl.BlockSpec((1, WCin), lambda n: (0, 0)),
                pl.BlockSpec((1, WCin), lambda n: (0, 0)),
                pl.BlockSpec(w_banded.shape, lambda n: (0, 0)),
                pl.BlockSpec((1, WCout), lambda n: (0, 0)),
            ],
            out_specs=(
                pl.BlockSpec((1, H, WCout), lambda n: (n, 0, 0)),
                pl.BlockSpec((1, 1, WCout), lambda n: (n, 0, 0)),
                pl.BlockSpec((1, 1, WCout), lambda n: (n, 0, 0)),
            ),
            scratch_shapes=[
                pltpu.VMEM((H + 2 * _PADT, WCin), jnp.float32),
            ],
        ),
        compiler_params=pltpu.CompilerParams(
            dimension_semantics=("parallel",),
            vmem_limit_bytes=32 * 1024 * 1024,
        ),
        cost_estimate=pl.CostEstimate(flops=flops, transcendentals=0,
                                      bytes_accessed=bytes_accessed),
    )(x, scale_t, shift_t, w_banded, bias_t)


def _bn_relu(x, scale_t, shift_t):
    N, H, WC = x.shape
    return pl.pallas_call(
        _bn_relu_kernel,
        out_shape=jax.ShapeDtypeStruct((N, H, WC), jnp.float32),
        grid_spec=pltpu.PrefetchScalarGridSpec(
            num_scalar_prefetch=0,
            grid=(N,),
            in_specs=[
                pl.BlockSpec((1, H, WC), lambda n: (n, 0, 0)),
                pl.BlockSpec((1, WC), lambda n: (0, 0)),
                pl.BlockSpec((1, WC), lambda n: (0, 0)),
            ],
            out_specs=pl.BlockSpec((1, H, WC), lambda n: (n, 0, 0)),
        ),
        compiler_params=pltpu.CompilerParams(
            dimension_semantics=("parallel",),
            vmem_limit_bytes=32 * 1024 * 1024,
        ),
        cost_estimate=pl.CostEstimate(flops=2 * x.size, transcendentals=0,
                                      bytes_accessed=4 * 2 * x.size),
    )(x, scale_t, shift_t)


# ----------------------------------------------------------------------------
# Host-side helpers (tiny O(C) / O(W^2*C^2) weight/stat plumbing).
# ----------------------------------------------------------------------------
def _band_weights(w_hwio, width):
    """HWIO (3,3,Cin,Cout) -> (3*W*Cin, W*Cout) W-banded, K-flattened weights.

    Row index = kh*(W*Cin) + w_src*Cin + ci ; column = w_dst*Cout + co.
    Entry is w[kh, w_src - w_dst + 1, ci, co] inside the band, 0 outside
    (the band clipping reproduces the W-direction zero padding exactly).
    """
    kh, kw, cin, cout = w_hwio.shape
    placement = np.zeros((kw, width, width), np.float32)
    for k in range(kw):
        for wd in range(width):
            ws = wd + k - 1
            if 0 <= ws < width:
                placement[k, ws, wd] = 1.0
    m = jnp.einsum("kpq,hkio->hpiqo", placement, w_hwio)  # (3, W, Cin, W, Cout)
    return m.reshape(kh * width * cin, width * cout)


def _tile_channels(v, width):
    """(C,) per-channel vector -> (1, W*C) tiled across the folded lane axis."""
    return jnp.tile(v, width).reshape(1, width * v.shape[0])


def _bn_scale_shift(ssum, ssq, gamma, beta, count):
    """Finish BN batch stats (biased variance, PyTorch training-mode forward)."""
    c = gamma.shape[0]
    total = jnp.sum(ssum.reshape(-1, c), axis=0)
    total_sq = jnp.sum(ssq.reshape(-1, c), axis=0)
    mean = total / count
    var = total_sq / count - mean * mean
    inv = jax.lax.rsqrt(var + EPS)
    scale = gamma * inv
    shift = beta - mean * scale
    return scale, shift


@jax.jit
def conv_block_forward(x_nchw, params):
    """Forward of ConvBlock. Input/output NCHW (PyTorch convention)."""
    w1, b1, g1, be1, w2, b2, g2, be2 = params
    N, Cin, H, W = x_nchw.shape
    C2 = w2.shape[-1]
    count = N * H * W

    # Boundary glue: NCHW -> NHWC -> lane-dense (N, H, W*Cin).
    x = jnp.transpose(x_nchw, (0, 2, 3, 1)).reshape(N, H, W * Cin)

    w1b = _band_weights(w1, W)                   # (3*W*Cin, W*C1)
    w2b = _band_weights(w2, W)                   # (3*W*C1,  W*C2)
    b1t = _tile_channels(b1, W)
    b2t = _tile_channels(b2, W)

    # conv1 (+ BN1 partial stats); no prologue on the raw input.
    ones = jnp.ones((1, W * Cin), jnp.float32)
    zeros = jnp.zeros((1, W * Cin), jnp.float32)
    y1, s1, q1 = _conv3x3_fused(x, ones, zeros, w1b, b1t,
                                apply_bn_relu_prologue=False)

    # BN1+ReLU fused as conv2's prologue (+ BN2 partial stats).
    scale1, shift1 = _bn_scale_shift(s1, q1, g1, be1, count)
    y2, s2, q2 = _conv3x3_fused(y1, _tile_channels(scale1, W),
                                _tile_channels(shift1, W), w2b, b2t,
                                apply_bn_relu_prologue=True)

    # Final BN2 + ReLU epilogue.
    scale2, shift2 = _bn_scale_shift(s2, q2, g2, be2, count)
    out = _bn_relu(y2, _tile_channels(scale2, W), _tile_channels(shift2, W))

    out = out.reshape(N, H, W, C2)               # un-fold lanes
    return jnp.transpose(out, (0, 3, 1, 2))      # NHWC -> NCHW


def init_params(key, in_channels, out_channels):
    """Deterministic synthetic init; conv weights OIHW -> HWIO."""
    k1, k2, k3, k4 = jax.random.split(key, 4)
    w1_oihw = jax.random.normal(k1, (out_channels, in_channels, 3, 3),
                                jnp.float32) * 0.1
    b1 = jax.random.normal(k2, (out_channels,), jnp.float32) * 0.1
    w2_oihw = jax.random.normal(k3, (out_channels, out_channels, 3, 3),
                                jnp.float32) * 0.1
    b2 = jax.random.normal(k4, (out_channels,), jnp.float32) * 0.1
    g1 = jnp.ones((out_channels,), jnp.float32)    # BatchNorm2d init: gamma=1
    be1 = jnp.zeros((out_channels,), jnp.float32)  # beta=0
    g2 = jnp.ones((out_channels,), jnp.float32)
    be2 = jnp.zeros((out_channels,), jnp.float32)
    w1 = jnp.transpose(w1_oihw, (2, 3, 1, 0))      # OIHW -> HWIO
    w2 = jnp.transpose(w2_oihw, (2, 3, 1, 0))
    return (w1, b1, g1, be1, w2, b2, g2, be2)


# ----------------------------------------------------------------------------
# Pure-JAX reference (correctness check against the Pallas kernels).
# ----------------------------------------------------------------------------
def _ref_forward(x_nchw, params):
    w1, b1, g1, be1, w2, b2, g2, be2 = params

    def conv(x, w, b):  # x NCHW, w HWIO
        y = jax.lax.conv_general_dilated(
            x, w, window_strides=(1, 1), padding="SAME",
            dimension_numbers=("NCHW", "HWIO", "NCHW"))
        return y + b[None, :, None, None]

    def bn_relu_ref(x, g, be):
        mean = jnp.mean(x, axis=(0, 2, 3), keepdims=True)
        var = jnp.mean((x - mean) ** 2, axis=(0, 2, 3), keepdims=True)
        y = (x - mean) / jnp.sqrt(var + EPS)
        y = y * g[None, :, None, None] + be[None, :, None, None]
        return jnp.maximum(y, 0.0)

    y = bn_relu_ref(conv(x_nchw, w1, b1), g1, be1)
    y = bn_relu_ref(conv(y, w2, b2), g2, be2)
    return y


if __name__ == "__main__":
    key = jax.random.PRNGKey(0)
    kx, kp = jax.random.split(key)

    N, Cin, Cout, H, W = 2, 4, 8, 16, 16
    x = jax.random.normal(kx, (N, Cin, H, W), jnp.float32)
    params = init_params(kp, Cin, Cout)

    out = conv_block_forward(x, params)
    out = jax.block_until_ready(out)

    ref = _ref_forward(x, params)
    assert out.shape == (N, Cout, H, W), out.shape
    max_err = float(jnp.max(jnp.abs(out - ref)))
    assert jnp.allclose(out, ref, rtol=1e-4, atol=1e-4), max_err

    print("KERNEL_OK")
</pallas_src>

<mosaic_0001>
module attributes {stable_mosaic.version = 11 : i64} {
  func.func @_conv3x3_fused_kernel(%arg0: i32, %arg1: memref<1x16x64xf32, #tpu.memory_space<vmem>>, %arg2: memref<1x64xf32, #tpu.memory_space<vmem>>, %arg3: memref<1x64xf32, #tpu.memory_space<vmem>>, %arg4: memref<192x128xf32, #tpu.memory_space<vmem>>, %arg5: memref<1x128xf32, #tpu.memory_space<vmem>>, %arg6: memref<1x16x128xf32, #tpu.memory_space<vmem>>, %arg7: memref<1x1x128xf32, #tpu.memory_space<vmem>>, %arg8: memref<1x1x128xf32, #tpu.memory_space<vmem>>, %arg9: memref<32x64xf32, #tpu.memory_space<vmem>>) attributes {dimension_semantics = [#tpu.dimension_semantics<parallel>], iteration_bounds = array<i64: 2>, scalar_prefetch = 0 : i64, scratch_operands = 1 : i64, tpu.core_type = #tpu.core_type<tc>, window_params = [{transform_indices = @transform_0, window_bounds = array<i64: 1, 16, 64>}, {pipeline_mode = #tpu.pipeline_mode<synchronous>, transform_indices = @transform_1, window_bounds = array<i64: 1, 64>}, {pipeline_mode = #tpu.pipeline_mode<synchronous>, transform_indices = @transform_2, window_bounds = array<i64: 1, 64>}, {pipeline_mode = #tpu.pipeline_mode<synchronous>, transform_indices = @transform_3, window_bounds = array<i64: 192, 128>}, {pipeline_mode = #tpu.pipeline_mode<synchronous>, transform_indices = @transform_4, window_bounds = array<i64: 1, 128>}, {transform_indices = @transform_5, window_bounds = array<i64: 1, 16, 128>}, {transform_indices = @transform_6, window_bounds = array<i64: 1, 1, 128>}, {transform_indices = @transform_7, window_bounds = array<i64: 1, 1, 128>}]} {
    %c0 = arith.constant 0 : index
    %c0_0 = arith.constant 0 : index
    %c0_1 = arith.constant 0 : index
    %0 = vector.load %arg1[%c0, %c0_0, %c0_1] : memref<1x16x64xf32, #tpu.memory_space<vmem>>, vector<1x16x64xf32>
    %1 = vector.shape_cast %0 : vector<1x16x64xf32> to vector<16x64xf32>
    %cst = arith.constant 0.000000e+00 : f32
    %2 = vector.broadcast %cst : f32 to vector<32x64xf32>
    %c0_2 = arith.constant 0 : index
    %c0_3 = arith.constant 0 : index
    %3 = vector.load %arg9[%c0_2, %c0_3] : memref<32x64xf32, #tpu.memory_space<vmem>>, vector<32x64xf32>
    tpu.vector_store %arg9[%c0_2, %c0_3], %2 {strides = array<i32>} : memref<32x64xf32, #tpu.memory_space<vmem>>, vector<32x64xf32>,
    %c8 = arith.constant 8 : index
    %c0_4 = arith.constant 0 : index
    %4 = vector.load %arg9[%c8, %c0_4] : memref<32x64xf32, #tpu.memory_space<vmem>>, vector<16x64xf32>
    tpu.vector_store %arg9[%c8, %c0_4], %1 {strides = array<i32>} : memref<32x64xf32, #tpu.memory_space<vmem>>, vector<16x64xf32>,
    %c0_5 = arith.constant 0 : index
    %c0_6 = arith.constant 0 : index
    %5 = vector.load %arg9[%c0_5, %c0_6] : memref<32x64xf32, #tpu.memory_space<vmem>>, vector<32x64xf32>
    %6 = vector.extract_strided_slice %5 {offsets = [7, 0], sizes = [16, 64], strides = [1, 1]} : vector<32x64xf32> to vector<16x64xf32>
    %7 = vector.extract_strided_slice %5 {offsets = [8, 0], sizes = [16, 64], strides = [1, 1]} : vector<32x64xf32> to vector<16x64xf32>
    %8 = vector.extract_strided_slice %5 {offsets = [9, 0], sizes = [16, 64], strides = [1, 1]} : vector<32x64xf32> to vector<16x64xf32>
    %9 = tpu.concatenate %6, %7, %8 in 1 : vector<16x64xf32>, vector<16x64xf32>, vector<16x64xf32> -> vector<16x192xf32>
    %c0_7 = arith.constant 0 : index
    %c0_8 = arith.constant 0 : index
    %10 = vector.load %arg4[%c0_7, %c0_8] : memref<192x128xf32, #tpu.memory_space<vmem>>, vector<192x128xf32>
    %cst_9 = arith.constant dense<0.000000e+00> : vector<16x128xf32>
    %11 = tpu.matmul %9, %10, %cst_9 {dimension_numbers = #tpu.dot_dimension_numbers<[1], [0], [0], [1], [0, 0, 1, 1], [], []>} : vector<16x192xf32>, vector<192x128xf32>, vector<16x128xf32> -> vector<16x128xf32>
    %c0_10 = arith.constant 0 : index
    %c0_11 = arith.constant 0 : index
    %12 = vector.load %arg5[%c0_10, %c0_11] : memref<1x128xf32, #tpu.memory_space<vmem>>, vector<1x128xf32>
    %13 = vector.broadcast %12 : vector<1x128xf32> to vector<16x128xf32>
    %14 = arith.addf %11, %13 : vector<16x128xf32>
    %15 = vector.shape_cast %14 : vector<16x128xf32> to vector<1x16x128xf32>
    %c0_12 = arith.constant 0 : index
    %c0_13 = arith.constant 0 : index
    %c0_14 = arith.constant 0 : index
    %16 = vector.load %arg6[%c0_12, %c0_13, %c0_14] : memref<1x16x128xf32, #tpu.memory_space<vmem>>, vector<1x16x128xf32>
    tpu.vector_store %arg6[%c0_12, %c0_13, %c0_14], %15 {strides = array<i32>} : memref<1x16x128xf32, #tpu.memory_space<vmem>>, vector<1x16x128xf32>,
    %cst_15 = arith.constant dense<0.000000e+00> : vector<128xf32>
    %17 = vector.multi_reduction <add>, %14, %cst_15 [0] : vector<16x128xf32> to vector<128xf32>
    %18 = vector.shape_cast %17 : vector<128xf32> to vector<1x128xf32>
    %19 = vector.shape_cast %18 : vector<1x128xf32> to vector<1x1x128xf32>
    %c0_16 = arith.constant 0 : index
    %c0_17 = arith.constant 0 : index
    %c0_18 = arith.constant 0 : index
    %20 = vector.load %arg7[%c0_16, %c0_17, %c0_18] : memref<1x1x128xf32, #tpu.memory_space<vmem>>, vector<1x1x128xf32>
    tpu.vector_store %arg7[%c0_16, %c0_17, %c0_18], %19 {strides = array<i32>} : memref<1x1x128xf32, #tpu.memory_space<vmem>>, vector<1x1x128xf32>,
    %21 = arith.mulf %14, %14 : vector<16x128xf32>
    %cst_19 = arith.constant dense<0.000000e+00> : vector<128xf32>
    %22 = vector.multi_reduction <add>, %21, %cst_19 [0] : vector<16x128xf32> to vector<128xf32>
    %23 = vector.shape_cast %22 : vector<128xf32> to vector<1x128xf32>
    %24 = vector.shape_cast %23 : vector<1x128xf32> to vector<1x1x128xf32>
    %c0_20 = arith.constant 0 : index
    %c0_21 = arith.constant 0 : index
    %c0_22 = arith.constant 0 : index
    %25 = vector.load %arg8[%c0_20, %c0_21, %c0_22] : memref<1x1x128xf32, #tpu.memory_space<vmem>>, vector<1x1x128xf32>
    tpu.vector_store %arg8[%c0_20, %c0_21, %c0_22], %24 {strides = array<i32>} : memref<1x1x128xf32, #tpu.memory_space<vmem>>, vector<1x1x128xf32>,
    return
  }
  func.func @transform_0(%arg0: i32) -> (i32, i32, i32) {
    %c0_i32 = arith.constant 0 : i32
    %c0_i32_0 = arith.constant 0 : i32
    %c0_i32_1 = arith.constant 0 : i32
    return %arg0, %c0_i32, %c0_i32_0 : i32, i32, i32
  }
  func.func @transform_1(%arg0: i32) -> (i32, i32) {
    %c0_i32 = arith.constant 0 : i32
    %c0_i32_0 = arith.constant 0 : i32
    %c0_i32_1 = arith.constant 0 : i32
    return %c0_i32, %c0_i32_0 : i32, i32
  }
  func.func @transform_2(%arg0: i32) -> (i32, i32) {
    %c0_i32 = arith.constant 0 : i32
    %c0_i32_0 = arith.constant 0 : i32
    %c0_i32_1 = arith.constant 0 : i32
    return %c0_i32, %c0_i32_0 : i32, i32
  }
  func.func @transform_3(%arg0: i32) -> (i32, i32) {
    %c0_i32 = arith.constant 0 : i32
    %c0_i32_0 = arith.constant 0 : i32
    %c0_i32_1 = arith.constant 0 : i32
    return %c0_i32, %c0_i32_0 : i32, i32
  }
  func.func @transform_4(%arg0: i32) -> (i32, i32) {
    %c0_i32 = arith.constant 0 : i32
    %c0_i32_0 = arith.constant 0 : i32
    %c0_i32_1 = arith.constant 0 : i32
    return %c0_i32, %c0_i32_0 : i32, i32
  }
  func.func @transform_5(%arg0: i32) -> (i32, i32, i32) {
    %c0_i32 = arith.constant 0 : i32
    %c0_i32_0 = arith.constant 0 : i32
    %c0_i32_1 = arith.constant 0 : i32
    return %arg0, %c0_i32, %c0_i32_0 : i32, i32, i32
  }
  func.func @transform_6(%arg0: i32) -> (i32, i32, i32) {
    %c0_i32 = arith.constant 0 : i32
    %c0_i32_0 = arith.constant 0 : i32
    %c0_i32_1 = arith.constant 0 : i32
    return %arg0, %c0_i32, %c0_i32_0 : i32, i32, i32
  }
  func.func @transform_7(%arg0: i32) -> (i32, i32, i32) {
    %c0_i32 = arith.constant 0 : i32
    %c0_i32_0 = arith.constant 0 : i32
    %c0_i32_1 = arith.constant 0 : i32
    return %arg0, %c0_i32, %c0_i32_0 : i32, i32, i32
  }
}

module attributes {stable_mosaic.version = 11 : i64} {
  func.func @_conv3x3_fused_kernel(%arg0: i32, %arg1: memref<1x16x128xf32, #tpu.memory_space<vmem>>, %arg2: memref<1x128xf32, #tpu.memory_space<vmem>>, %arg3: memref<1x128xf32, #tpu.memory_space<vmem>>, %arg4: memref<384x128xf32, #tpu.memory_space<vmem>>, %arg5: memref<1x128xf32, #tpu.memory_space<vmem>>, %arg6: memref<1x16x128xf32, #tpu.memory_space<vmem>>, %arg7: memref<1x1x128xf32, #tpu.memory_space<vmem>>, %arg8: memref<1x1x128xf32, #tpu.memory_space<vmem>>, %arg9: memref<32x128xf32, #tpu.memory_space<vmem>>) attributes {dimension_semantics = [#tpu.dimension_semantics<parallel>], iteration_bounds = array<i64: 2>, scalar_prefetch = 0 : i64, scratch_operands = 1 : i64, tpu.core_type = #tpu.core_type<tc>, window_params = [{transform_indices = @transform_0, window_bounds = array<i64: 1, 16, 128>}, {pipeline_mode = #tpu.pipeline_mode<synchronous>, transform_indices = @transform_1, window_bounds = array<i64: 1, 128>}, {pipeline_mode = #tpu.pipeline_mode<synchronous>, transform_indices = @transform_2, window_bounds = array<i64: 1, 128>}, {pipeline_mode = #tpu.pipeline_mode<synchronous>, transform_indices = @transform_3, window_bounds = array<i64: 384, 128>}, {pipeline_mode = #tpu.pipeline_mode<synchronous>, transform_indices = @transform_4, window_bounds = array<i64: 1, 128>}, {transform_indices = @transform_5, window_bounds = array<i64: 1, 16, 128>}, {transform_indices = @transform_6, window_bounds = array<i64: 1, 1, 128>}, {transform_indices = @transform_7, window_bounds = array<i64: 1, 1, 128>}]} {
    %c0 = arith.constant 0 : index
    %c0_0 = arith.constant 0 : index
    %c0_1 = arith.constant 0 : index
    %0 = vector.load %arg1[%c0, %c0_0, %c0_1] : memref<1x16x128xf32, #tpu.memory_space<vmem>>, vector<1x16x128xf32>
    %1 = vector.shape_cast %0 : vector<1x16x128xf32> to vector<16x128xf32>
    %c0_2 = arith.constant 0 : index
    %c0_3 = arith.constant 0 : index
    %2 = vector.load %arg2[%c0_2, %c0_3] : memref<1x128xf32, #tpu.memory_space<vmem>>, vector<1x128xf32>
    %3 = vector.broadcast %2 : vector<1x128xf32> to vector<16x128xf32>
    %4 = arith.mulf %1, %3 : vector<16x128xf32>
    %c0_4 = arith.constant 0 : index
    %c0_5 = arith.constant 0 : index
    %5 = vector.load %arg3[%c0_4, %c0_5] : memref<1x128xf32, #tpu.memory_space<vmem>>, vector<1x128xf32>
    %6 = vector.broadcast %5 : vector<1x128xf32> to vector<16x128xf32>
    %7 = arith.addf %4, %6 : vector<16x128xf32>
    %cst = arith.constant 0.000000e+00 : f32
    %8 = vector.broadcast %cst : f32 to vector<16x128xf32>
    %9 = arith.maximumf %7, %8 : vector<16x128xf32>
    %cst_6 = arith.constant 0.000000e+00 : f32
    %10 = vector.broadcast %cst_6 : f32 to vector<32x128xf32>
    %c0_7 = arith.constant 0 : index
    %c0_8 = arith.constant 0 : index
    %11 = vector.load %arg9[%c0_7, %c0_8] : memref<32x128xf32, #tpu.memory_space<vmem>>, vector<32x128xf32>
    tpu.vector_store %arg9[%c0_7, %c0_8], %10 {strides = array<i32>} : memref<32x128xf32, #tpu.memory_space<vmem>>, vector<32x128xf32>,
    %c8 = arith.constant 8 : index
    %c0_9 = arith.constant 0 : index
    %12 = vector.load %arg9[%c8, %c0_9] : memref<32x128xf32, #tpu.memory_space<vmem>>, vector<16x128xf32>
    tpu.vector_store %arg9[%c8, %c0_9], %9 {strides = array<i32>} : memref<32x128xf32, #tpu.memory_space<vmem>>, vector<16x128xf32>,
    %c0_10 = arith.constant 0 : index
    %c0_11 = arith.constant 0 : index
    %13 = vector.load %arg9[%c0_10, %c0_11] : memref<32x128xf32, #tpu.memory_space<vmem>>, vector<32x128xf32>
    %14 = vector.extract_strided_slice %13 {offsets = [7, 0], sizes = [16, 128], strides = [1, 1]} : vector<32x128xf32> to vector<16x128xf32>
    %15 = vector.extract_strided_slice %13 {offsets = [8, 0], sizes = [16, 128], strides = [1, 1]} : vector<32x128xf32> to vector<16x128xf32>
    %16 = vector.extract_strided_slice %13 {offsets = [9, 0], sizes = [16, 128], strides = [1, 1]} : vector<32x128xf32> to vector<16x128xf32>
    %17 = tpu.concatenate %14, %15, %16 in 1 : vector<16x128xf32>, vector<16x128xf32>, vector<16x128xf32> -> vector<16x384xf32>
    %c0_12 = arith.constant 0 : index
    %c0_13 = arith.constant 0 : index
    %18 = vector.load %arg4[%c0_12, %c0_13] : memref<384x128xf32, #tpu.memory_space<vmem>>, vector<384x128xf32>
    %cst_14 = arith.constant dense<0.000000e+00> : vector<16x128xf32>
    %19 = tpu.matmul %17, %18, %cst_14 {dimension_numbers = #tpu.dot_dimension_numbers<[1], [0], [0], [1], [0, 0, 1, 1], [], []>} : vector<16x384xf32>, vector<384x128xf32>, vector<16x128xf32> -> vector<16x128xf32>
    %c0_15 = arith.constant 0 : index
    %c0_16 = arith.constant 0 : index
    %20 = vector.load %arg5[%c0_15, %c0_16] : memref<1x128xf32, #tpu.memory_space<vmem>>, vector<1x128xf32>
    %21 = vector.broadcast %20 : vector<1x128xf32> to vector<16x128xf32>
    %22 = arith.addf %19, %21 : vector<16x128xf32>
    %23 = vector.shape_cast %22 : vector<16x128xf32> to vector<1x16x128xf32>
    %c0_17 = arith.constant 0 : index
    %c0_18 = arith.constant 0 : index
    %c0_19 = arith.constant 0 : index
    %24 = vector.load %arg6[%c0_17, %c0_18, %c0_19] : memref<1x16x128xf32, #tpu.memory_space<vmem>>, vector<1x16x128xf32>
    tpu.vector_store %arg6[%c0_17, %c0_18, %c0_19], %23 {strides = array<i32>} : memref<1x16x128xf32, #tpu.memory_space<vmem>>, vector<1x16x128xf32>,
    %cst_20 = arith.constant dense<0.000000e+00> : vector<128xf32>
    %25 = vector.multi_reduction <add>, %22, %cst_20 [0] : vector<16x128xf32> to vector<128xf32>
    %26 = vector.shape_cast %25 : vector<128xf32> to vector<1x128xf32>
    %27 = vector.shape_cast %26 : vector<1x128xf32> to vector<1x1x128xf32>
    %c0_21 = arith.constant 0 : index
    %c0_22 = arith.constant 0 : index
    %c0_23 = arith.constant 0 : index
    %28 = vector.load %arg7[%c0_21, %c0_22, %c0_23] : memref<1x1x128xf32, #tpu.memory_space<vmem>>, vector<1x1x128xf32>
    tpu.vector_store %arg7[%c0_21, %c0_22, %c0_23], %27 {strides = array<i32>} : memref<1x1x128xf32, #tpu.memory_space<vmem>>, vector<1x1x128xf32>,
    %29 = arith.mulf %22, %22 : vector<16x128xf32>
    %cst_24 = arith.constant dense<0.000000e+00> : vector<128xf32>
    %30 = vector.multi_reduction <add>, %29, %cst_24 [0] : vector<16x128xf32> to vector<128xf32>
    %31 = vector.shape_cast %30 : vector<128xf32> to vector<1x128xf32>
    %32 = vector.shape_cast %31 : vector<1x128xf32> to vector<1x1x128xf32>
    %c0_25 = arith.constant 0 : index
    %c0_26 = arith.constant 0 : index
    %c0_27 = arith.constant 0 : index
    %33 = vector.load %arg8[%c0_25, %c0_26, %c0_27] : memref<1x1x128xf32, #tpu.memory_space<vmem>>, vector<1x1x128xf32>
    tpu.vector_store %arg8[%c0_25, %c0_26, %c0_27], %32 {strides = array<i32>} : memref<1x1x128xf32, #tpu.memory_space<vmem>>, vector<1x1x128xf32>,
    return
  }
  func.func @transform_0(%arg0: i32) -> (i32, i32, i32) {
    %c0_i32 = arith.constant 0 : i32
    %c0_i32_0 = arith.constant 0 : i32
    %c0_i32_1 = arith.constant 0 : i32
    return %arg0, %c0_i32, %c0_i32_0 : i32, i32, i32
  }
  func.func @transform_1(%arg0: i32) -> (i32, i32) {
    %c0_i32 = arith.constant 0 : i32
    %c0_i32_0 = arith.constant 0 : i32
    %c0_i32_1 = arith.constant 0 : i32
    return %c0_i32, %c0_i32_0 : i32, i32
  }
  func.func @transform_2(%arg0: i32) -> (i32, i32) {
    %c0_i32 = arith.constant 0 : i32
    %c0_i32_0 = arith.constant 0 : i32
    %c0_i32_1 = arith.constant 0 : i32
    return %c0_i32, %c0_i32_0 : i32, i32
  }
  func.func @transform_3(%arg0: i32) -> (i32, i32) {
    %c0_i32 = arith.constant 0 : i32
    %c0_i32_0 = arith.constant 0 : i32
    %c0_i32_1 = arith.constant 0 : i32
    return %c0_i32, %c0_i32_0 : i32, i32
  }
  func.func @transform_4(%arg0: i32) -> (i32, i32) {
    %c0_i32 = arith.constant 0 : i32
    %c0_i32_0 = arith.constant 0 : i32
    %c0_i32_1 = arith.constant 0 : i32
    return %c0_i32, %c0_i32_0 : i32, i32
  }
  func.func @transform_5(%arg0: i32) -> (i32, i32, i32) {
    %c0_i32 = arith.constant 0 : i32
    %c0_i32_0 = arith.constant 0 : i32
    %c0_i32_1 = arith.constant 0 : i32
    return %arg0, %c0_i32, %c0_i32_0 : i32, i32, i32
  }
  func.func @transform_6(%arg0: i32) -> (i32, i32, i32) {
    %c0_i32 = arith.constant 0 : i32
    %c0_i32_0 = arith.constant 0 : i32
    %c0_i32_1 = arith.constant 0 : i32
    return %arg0, %c0_i32, %c0_i32_0 : i32, i32, i32
  }
  func.func @transform_7(%arg0: i32) -> (i32, i32, i32) {
    %c0_i32 = arith.constant 0 : i32
    %c0_i32_0 = arith.constant 0 : i32
    %c0_i32_1 = arith.constant 0 : i32
    return %arg0, %c0_i32, %c0_i32_0 : i32, i32, i32
  }
}

module attributes {stable_mosaic.version = 11 : i64} {
  func.func @_bn_relu_kernel(%arg0: i32, %arg1: memref<1x16x128xf32, #tpu.memory_space<vmem>>, %arg2: memref<1x128xf32, #tpu.memory_space<vmem>>, %arg3: memref<1x128xf32, #tpu.memory_space<vmem>>, %arg4: memref<1x16x128xf32, #tpu.memory_space<vmem>>) attributes {dimension_semantics = [#tpu.dimension_semantics<parallel>], iteration_bounds = array<i64: 2>, scalar_prefetch = 0 : i64, scratch_operands = 0 : i64, tpu.core_type = #tpu.core_type<tc>, window_params = [{transform_indices = @transform_0, window_bounds = array<i64: 1, 16, 128>}, {pipeline_mode = #tpu.pipeline_mode<synchronous>, transform_indices = @transform_1, window_bounds = array<i64: 1, 128>}, {pipeline_mode = #tpu.pipeline_mode<synchronous>, transform_indices = @transform_2, window_bounds = array<i64: 1, 128>}, {transform_indices = @transform_3, window_bounds = array<i64: 1, 16, 128>}]} {
    %c0 = arith.constant 0 : index
    %c0_0 = arith.constant 0 : index
    %c0_1 = arith.constant 0 : index
    %0 = vector.load %arg1[%c0, %c0_0, %c0_1] : memref<1x16x128xf32, #tpu.memory_space<vmem>>, vector<1x16x128xf32>
    %c0_2 = arith.constant 0 : index
    %c0_3 = arith.constant 0 : index
    %1 = vector.load %arg2[%c0_2, %c0_3] : memref<1x128xf32, #tpu.memory_space<vmem>>, vector<1x128xf32>
    %2 = vector.shape_cast %1 : vector<1x128xf32> to vector<1x1x128xf32>
    %3 = vector.broadcast %2 : vector<1x1x128xf32> to vector<1x16x128xf32>
    %4 = arith.mulf %0, %3 : vector<1x16x128xf32>
    %c0_4 = arith.constant 0 : index
    %c0_5 = arith.constant 0 : index
    %5 = vector.load %arg3[%c0_4, %c0_5] : memref<1x128xf32, #tpu.memory_space<vmem>>, vector<1x128xf32>
    %6 = vector.shape_cast %5 : vector<1x128xf32> to vector<1x1x128xf32>
    %7 = vector.broadcast %6 : vector<1x1x128xf32> to vector<1x16x128xf32>
    %8 = arith.addf %4, %7 : vector<1x16x128xf32>
    %cst = arith.constant 0.000000e+00 : f32
    %9 = vector.broadcast %cst : f32 to vector<1x16x128xf32>
    %10 = arith.maximumf %8, %9 : vector<1x16x128xf32>
    %c0_6 = arith.constant 0 : index
    %c0_7 = arith.constant 0 : index
    %c0_8 = arith.constant 0 : index
    %11 = vector.load %arg4[%c0_6, %c0_7, %c0_8] : memref<1x16x128xf32, #tpu.memory_space<vmem>>, vector<1x16x128xf32>
    tpu.vector_store %arg4[%c0_6, %c0_7, %c0_8], %10 {strides = array<i32>} : memref<1x16x128xf32, #tpu.memory_space<vmem>>, vector<1x16x128xf32>,
    return
  }
  func.func @transform_0(%arg0: i32) -> (i32, i32, i32) {
    %c0_i32 = arith.constant 0 : i32
    %c0_i32_0 = arith.constant 0 : i32
    %c0_i32_1 = arith.constant 0 : i32
    return %arg0, %c0_i32, %c0_i32_0 : i32, i32, i32
  }
  func.func @transform_1(%arg0: i32) -> (i32, i32) {
    %c0_i32 = arith.constant 0 : i32
    %c0_i32_0 = arith.constant 0 : i32
    %c0_i32_1 = arith.constant 0 : i32
    return %c0_i32, %c0_i32_0 : i32, i32
  }
  func.func @transform_2(%arg0: i32) -> (i32, i32) {
    %c0_i32 = arith.constant 0 : i32
    %c0_i32_0 = arith.constant 0 : i32
    %c0_i32_1 = arith.constant 0 : i32
    return %c0_i32, %c0_i32_0 : i32, i32
  }
  func.func @transform_3(%arg0: i32) -> (i32, i32, i32) {
    %c0_i32 = arith.constant 0 : i32
    %c0_i32_0 = arith.constant 0 : i32
    %c0_i32_1 = arith.constant 0 : i32
    return %arg0, %c0_i32, %c0_i32_0 : i32, i32, i32
  }
}

</mosaic_0001>

<bundles_post_ra>
// kernel: tile.33
= control target key start
LH: loop header
LB: loop body
LE: loop exit
PB: predicated region body
PF: predicated region fallthrough
CT: control target
= control target key end

     0   :  { %s28_s0 = inlined_call_operand.vmem [shape: f32[8], index: 0, kind: input, shape index: {}]   ;;  %s29_s1 = inlined_call_operand.vmem [shape: f32[16,8], index: 1, kind: output, shape index: {}]  }
   0x1   :  { %v4_v0 = vld [vmem:[%s28_s0] ss:$0 sm:$0xff] }
   0x2   :  { %5 = vst [vmem:[%s29_s1] sm:$0xff] %v4_v0  ;;  %8 = vst [vmem:[%s29_s1 + $0x8] sm:$0xff] %v4_v0 }

// kernel: tile.34
= control target key start
LH: loop header
LB: loop body
LE: loop exit
PB: predicated region body
PF: predicated region fallthrough
CT: control target
= control target key end

     0   :  { %s131_s10 = smov 120   ;;  %s132_s11 = smov 104   ;;  %vm3_vm0 = vcmask 64512   ;;  %vm9_vm1 = vcmask 1048512   ;;  %vm15_vm2 = vcmask 982912   ;;  %vm21_vm3 = vcmask 917312   ;;  %s207_s0 = inlined_call_operand.vmem [shape: f32[16,8], index: 0, kind: input, shape index: {}]   ;;  %s208_s1 = inlined_call_operand.vmem [shape: f32[1,128], index: 1, kind: output, shape index: {}]  }
   0x1   :  { %v101_v0 = vld [vmem:[%s207_s0 + $0xf] sm:$0x1]   ;;  %v103_v1 = vld [vmem:[%s207_s0 + $0xd] sm:$0x1]   ;;  %v102_v2 = vld [vmem:[%s207_s0 + $0xe] sm:$0x1]  }
   0x2   :  { %7 = vrot.lane.b32.xlu0 %v101_v0, %s131_s10  ;;  %19 = vrot.lane.b32.xlu1 %v103_v1, %s132_s11  ;;  %v104_v3 = vld [vmem:[%s207_s0 + $0xc] sm:$0x1]   ;;  %s133_s16 = smov 112   ;;  %s134_s17 = smov 96   ;;  %v105_v4 = vld [vmem:[%s207_s0 + $0xb] sm:$0x1]  }
   0x3   :  { %v106_v5 = vld [vmem:[%s207_s0 + $0xa] sm:$0x1]   ;;  %v2_v6 = vld [vmem:[%s207_s0] sm:$0x1]   ;;  %s135_s24 = smov 88   ;;  %s136_s25 = smov 80  }
   0x4   :  { %4 = vst.msk [vmem:[#allocation0] sm:$0x1] %vm3_vm0, %v2_v6   ;;  %v107_v7 = vld [vmem:[%s207_s0 + $0x9] sm:$0x1]   ;;  %v108_v8 = vld [vmem:[%s207_s0 + $0x8] sm:$0x1]  }
   0x5   :  { %s137_s30 = smov 72   ;;  %s138_s2 = smov 64   ;;  %v109_v9 = vld [vmem:[%s207_s0 + $0x7] sm:$0x1]   ;;  %v110_v10 = vld [vmem:[%s207_s0 + $0x6] sm:$0x1]  }
   0x6   :  { %13 = vrot.lane.b32.xlu0 %v102_v2, %s133_s16  ;;  %25 = vrot.lane.b32.xlu1 %v104_v3, %s134_s17  ;;  %s139_s7 = smov 56   ;;  %s140_s8 = smov 48   ;;  %v111_v11 = vld [vmem:[%s207_s0 + $0x5] sm:$0x1]   ;;  %v112_v12 = vld [vmem:[%s207_s0 + $0x4] sm:$0x1]  }
   0x7   :  { %s141_s13 = smov 40   ;;  %s142_s14 = smov 32   ;;  %v113_v13 = vld [vmem:[%s207_s0 + $0x3] sm:$0x1]   ;;  %v114_v14 = vld [vmem:[%s207_s0 + $0x2] sm:$0x1]  }
   0x8   :  { %s143_s19 = smov 24   ;;  %s144_s20 = smov 16   ;;  %v115_v15 = vld [vmem:[%s207_s0 + $0x1] sm:$0x1]   ;;  %vm27_vm4 = vcmask 851712   ;;  %vm33_vm5 = vcmask 786112  }
   0x9   :  { %s145_s0 = smov 8   ;;  %vm39_vm6 = vcmask 720512   ;;  %vm45_vm7 = vcmask 654912   ;;  %vm51_vm8 = vcmask 589312   ;;  %vm57_vm9 = vcmask 523712  }
   0xa   :  { %31 = vrot.lane.b32.xlu0 %v105_v4, %s135_s24  ;;  %37 = vrot.lane.b32.xlu1 %v106_v5, %s136_s25  ;;  %vm63_vm10 = vcmask 458112   ;;  %vm69_vm11 = vcmask 392512   ;;  %vm75_vm12 = vcmask 326912   ;;  %vm81_vm13 = vcmask 261312  }
   0xb   :  { %vm87_vm14 = vcmask 195712   ;;  %vm93_vm15 = vcmask 130112  }
   0xe   :  { %43 = vrot.lane.b32.xlu0 %v107_v7, %s137_s30  ;;  %49 = vrot.lane.b32.xlu1 %v108_v8, %s138_s2 }
  0x12   :  { %55 = vrot.lane.b32.xlu0 %v109_v9, %s139_s7  ;;  %61 = vrot.lane.b32.xlu1 %v110_v10, %s140_s8 }
  0x16   :  { %67 = vrot.lane.b32.xlu0 %v111_v11, %s141_s13  ;;  %73 = vrot.lane.b32.xlu1 %v112_v12, %s142_s14 }
  0x1a   :  { %79 = vrot.lane.b32.xlu0 %v113_v13, %s143_s19  ;;  %85 = vrot.lane.b32.xlu1 %v114_v14, %s144_s20 }
  0x1e   :  { %91 = vrot.lane.b32.xlu0 %v115_v15, %s145_s0 }
  0x74   :  { %v8_v16 = vpop.permute.xlu0 %7   ;;  %v20_v17 = vpop.permute.xlu1 %19  }
  0x75   :  { %10 = vst.msk [vmem:[#allocation0] sm:$0x1] %vm9_vm1, %v8_v16  }
  0x78   :  { %v14_v18 = vpop.permute.xlu0 %13   ;;  %v26_v19 = vpop.permute.xlu1 %25  }
  0x79   :  { %16 = vst.msk [vmem:[#allocation0] sm:$0x1] %vm15_vm2, %v14_v18  }
  0x7a   :  { %22 = vst.msk [vmem:[#allocation0] sm:$0x1] %vm21_vm3, %v20_v17  }
  0x7b   :  { %28 = vst.msk [vmem:[#allocation0] sm:$0x1] %vm27_vm4, %v26_v19  }
  0x7c   :  { %v32_v20 = vpop.permute.xlu0 %31   ;;  %v38_v21 = vpop.permute.xlu1 %37  }
  0x7d   :  { %34 = vst.msk [vmem:[#allocation0] sm:$0x1] %vm33_vm5, %v32_v20  }
  0x7e   :  { %40 = vst.msk [vmem:[#allocation0] sm:$0x1] %vm39_vm6, %v38_v21  }
  0x80   :  { %v44_v22 = vpop.permute.xlu0 %43   ;;  %v50_v23 = vpop.permute.xlu1 %49  }
  0x81   :  { %46 = vst.msk [vmem:[#allocation0] sm:$0x1] %vm45_vm7, %v44_v22  }
  0x82   :  { %52 = vst.msk [vmem:[#allocation0] sm:$0x1] %vm51_vm8, %v50_v23  }
  0x84   :  { %v56_v24 = vpop.permute.xlu0 %55   ;;  %v62_v25 = vpop.permute.xlu1 %61  }
  0x85   :  { %58 = vst.msk [vmem:[#allocation0] sm:$0x1] %vm57_vm9, %v56_v24  }
  0x86   :  { %64 = vst.msk [vmem:[#allocation0] sm:$0x1] %vm63_vm10, %v62_v25  }
  0x88   :  { %v68_v26 = vpop.permute.xlu0 %67   ;;  %v74_v27 = vpop.permute.xlu1 %73  }
  0x89   :  { %70 = vst.msk [vmem:[#allocation0] sm:$0x1] %vm69_vm11, %v68_v26  }
  0x8a   :  { %76 = vst.msk [vmem:[#allocation0] sm:$0x1] %vm75_vm12, %v74_v27  }
  0x8c   :  { %v80_v28 = vpop.permute.xlu0 %79   ;;  %v86_v29 = vpop.permute.xlu1 %85  }
  0x8d   :  { %82 = vst.msk [vmem:[#allocation0] sm:$0x1] %vm81_vm13, %v80_v28  }
  0x8e   :  { %88 = vst.msk [vmem:[#allocation0] sm:$0x1] %vm87_vm14, %v86_v29  }
  0x90   :  { %v92_v30 = vpop.permute.xlu0 %91  }
  0x91   :  { %94 = vst.msk [vmem:[#allocation0] sm:$0x1] %vm93_vm15, %v92_v30  }
  0x98   :  { %v98_v31 = vld [vmem:[#allocation0] sm:$0x1] }
  0x99   :  { %100 = vst [vmem:[%s208_s1] sm:$0x1] %v98_v31 }

// kernel: conv_block_forward.3
= control target key start
LH: loop header
LB: loop body
LE: loop exit
PB: predicated region body
PF: predicated region fallthrough
CT: control target
= control target key end

     0   :  { %s728_s24 = smov 0   ;;  %s886_s0 = inlined_call_operand.vmem [shape: f32[2,16,64], index: 0, kind: input, shape index: {}]   ;;  %s887_s1 = inlined_call_operand.vmem [shape: f32[1,64], index: 1, kind: input, shape index: {}]   ;;  %s888_s2 = inlined_call_operand.vmem [shape: f32[1,64], index: 2, kind: input, shape index: {}]   ;;  %s889_s3 = inlined_call_operand.vmem [shape: f32[192,128], index: 3, kind: input, shape index: {}]   ;;  %s890_s4 = inlined_call_operand.vmem [shape: f32[1,128], index: 4, kind: input, shape index: {}]   ;;  %s891_s5 = inlined_call_operand.vmem [shape: f32[2,16,128], index: 5, kind: output, shape index: {0}]   ;;  %s892_s6 = inlined_call_operand.vmem [shape: f32[2,1,128], index: 6, kind: output, shape index: {1}]   ;;  %s893_s7 = inlined_call_operand.vmem [shape: f32[2,1,128], index: 7, kind: output, shape index: {2}]  }
   0x1 LB: > { %s585_s1 = sadd.s32 4294967295, %s683_s24   ;;  %p589_p0 = scmp.ge.s32.totalorder %s683_s24, 1  ;;  %s683_s24 = sphi %s728_s24, %s18_s24  }
   0x2   : > { %p242_p1 = scmp.lt.s32.totalorder %s683_s24, 3 }
   0x4   : > { %p243_p2 = pnand %p589_p0, %p242_p1 }
   0x5   : > { %p280_p3 = scmp.lt.s32.totalorder (!%p243_p2), %s585_s1, 1  ;;  %vm298_vm0 = vcmask (!%p243_p2), 523264   ;;  %v685_v0 = vmov (!%p243_p2), 0.0   ;;  %v686_v1 = vmov (!%p243_p2), 0.0|0.0   ;;  %v334_v2 = vld [vmem:[%s889_s3] sm:$0xff] (!%p243_p2)  ;;  %v335_v3 = vld [vmem:[%s889_s3 + $0x8] sm:$0xff] (!%p243_p2) }
   0x6   : > { %246 = sbr.rel (%p243_p2) target bundleno = 384 (0x180), region = 40  ;;  %300 = vst.msk [vmem:[#allocation2 + $0x8] sm:$0xff] (!%p243_p2), %vm298_vm0, %v685_v0  ;;  %301 = vst.msk [vmem:[#allocation2 + $0x10] sm:$0xff] (!%p243_p2), %vm298_vm0, %v685_v0  ;;  %601 = vmatprep.subr.bf16.mxu0 (!%p243_p2), %v686_v1  ;;  %637 = vmatprep.subr.bf16.mxu1 (!%p243_p2), %v686_v1  ;;  %v336_v4 = vld [vmem:[%s889_s3 + $0x10] sm:$0xff] (!%p243_p2)  ;;  %v602_v5 = vpack.c.bf16 (!%p243_p2), %v335_v3, %v334_v2  ;;  %v337_v6 = vld [vmem:[%s889_s3 + $0x18] sm:$0xff] (!%p243_p2)  ;;  %vm311_vm1 = vcmask (!%p243_p2), 1046528  }
   0x7   : > { %299 = vst.msk [vmem:[#allocation2] sm:$0xff] (!%p243_p2), %vm298_vm0, %v685_v0  ;;  %302 = vst.msk [vmem:[#allocation2 + $0x18] sm:$0xff] (!%p243_p2), %vm298_vm0, %v685_v0  ;;  %v605_v7 = vpack.c.bf16 (!%p243_p2), %v337_v6, %v336_v4  ;;  %v338_v8 = vld [vmem:[%s889_s3 + $0x20] sm:$0xff] (!%p243_p2)  ;;  %v339_v9 = vld [vmem:[%s889_s3 + $0x28] sm:$0xff] (!%p243_p2)  ;;  %vm325_vm2 = vcmask (!%p243_p2), 1045504   ;;  %vm368_vm3 = vcmask (!%p243_p2), 1040384  }
   0x8   : > { %603 = vmatpush1.bf16.msra.mxu0 (!%p243_p2), %v602_v5  ;;  %649 = vmatpush1.bf16.msra.mxu1 (!%p243_p2), %v602_v5  ;;  %v608_v12 = vpack.c.bf16 (!%p243_p2), %v339_v9, %v338_v8  ;;  %v340_v13 = vld [vmem:[%s889_s3 + $0x30] sm:$0xff] (!%p243_p2)  ;;  %v341_v14 = vld [vmem:[%s889_s3 + $0x38] sm:$0xff] (!%p243_p2)  ;;  %v342_v17 = vld [vmem:[%s889_s3 + $0x40] sm:$0xff] (!%p243_p2)  ;;  %s687_s29 = smov (!%p243_p2), 64  }
   0x9   : > { %604 = vmatprep.subr.bf16.mxu0 (!%p243_p2), %v686_v1  ;;  %638 = vmatprep.subr.bf16.mxu1 (!%p243_p2), %v686_v1  ;;  %v611_v16 = vpack.c.bf16 (!%p243_p2), %v341_v14, %v340_v13  ;;  %v343_v18 = vld [vmem:[%s889_s3 + $0x48] sm:$0xff] (!%p243_p2)  ;;  %v344_v28 = vld [vmem:[%s889_s3 + $0x50] sm:$0xff] (!%p243_p2)  ;;  %v345_v29 = vld [vmem:[%s889_s3 + $0x58] sm:$0xff] (!%p243_p2) }
   0xa   : > { %v614_v26 = vpack.c.bf16 (!%p243_p2), %v343_v18, %v342_v17  ;;  %v617_v36 = vpack.c.bf16 (!%p243_p2), %v345_v29, %v344_v28  ;;  %v346_v39 = vld [vmem:[%s889_s3 + $0x60] sm:$0xff] (!%p243_p2)  ;;  %v347_v40 = vld [vmem:[%s889_s3 + $0x68] sm:$0xff] (!%p243_p2)  ;;  %v348_v42 = vld [vmem:[%s889_s3 + $0x70] sm:$0xff] (!%p243_p2) }
   0xb   : > { %v620_v41 = vpack.c.bf16 (!%p243_p2), %v347_v40, %v346_v39  ;;  %v349_v43 = vld [vmem:[%s889_s3 + $0x78] sm:$0xff] (!%p243_p2)  ;;  %v350_v45 = vld [vmem:[%s889_s3 + $0x80] sm:$0xff] (!%p243_p2)  ;;  %v351_v46 = vld [vmem:[%s889_s3 + $0x88] sm:$0xff] (!%p243_p2) }
   0xc   : > { %606 = vmatpush1.bf16.msra.mxu0 (!%p243_p2), %v605_v7  ;;  %650 = vmatpush1.bf16.msra.mxu1 (!%p243_p2), %v605_v7  ;;  %v623_v44 = vpack.c.bf16 (!%p243_p2), %v349_v43, %v348_v42  ;;  %v626_v47 = vpack.c.bf16 (!%p243_p2), %v351_v46, %v350_v45  ;;  %v352_v48 = vld [vmem:[%s889_s3 + $0x90] sm:$0xff] (!%p243_p2)  ;;  %v353_v49 = vld [vmem:[%s889_s3 + $0x98] sm:$0xff] (!%p243_p2)  ;;  %v354_v51 = vld [vmem:[%s889_s3 + $0xa0] sm:$0xff] (!%p243_p2) }
   0xd   : > { %s895_s1 = smov (!%p280_p3, %s585_s1), 1  ;;  %607 = vmatprep.subr.bf16.mxu0 %v686_v1  ;;  %639 = vmatprep.subr.bf16.mxu1 %v686_v1  ;;  %v629_v50 = vpack.c.bf16 %v353_v49, %v352_v48  ;;  %v355_v52 = vld [vmem:[%s889_s3 + $0xa8] sm:$0xff]  ;;  %v356_v54 = vld [vmem:[%s889_s3 + $0xb0] sm:$0xff]  ;;  %v357_v55 = vld [vmem:[%s889_s3 + $0xb8] sm:$0xff] }
   0xe   : > { %s599_s9 = sshll.u32 %s895_s1, 4  ;;  %v308_v15 = vld [vmem:[#allocation2 + $0x18] sm:$0xff]  ;;  %v632_v53 = vpack.c.bf16 %v355_v52, %v354_v51  ;;  %v635_v56 = vpack.c.bf16 %v357_v55, %v356_v54  ;;  %v305_v57 = vld [vmem:[#allocation2] sm:$0xff]  ;;  %s292_s16 = scalar_lea.vmem %s892_s6, %s895_s1 }
   0xf   : > { %s284_s12 = scalar_lea.vmem %s886_s0, %s599_s9  ;;  %v329_v19 = vrot.slane %v308_v15, 2  ;;  %v594_v6 = vld [vmem:[%s890_s4] ss:$0 sm:$0xff]  ;;  %s289_s14 = scalar_lea.vmem %s891_s5, %s599_s9 }
  0x10   : > { %v296_v10 = vld [vmem:[%s284_s12] sm:$0xff]  ;;  %v297_v11 = vld [vmem:[%s284_s12 + $0x8] sm:$0xff]  ;;  %609 = vmatpush1.bf16.msra.mxu0 %v608_v12  ;;  %651 = vmatpush1.bf16.msra.mxu1 %v608_v12  ;;  %s295_s19 = scalar_lea.vmem %s893_s7, %s895_s1 }
  0x11   : > { %303 = vst.msk [vmem:[#allocation2 + $0x8] sm:$0xff] %vm298_vm0, %v296_v10  ;;  %304 = vst.msk [vmem:[#allocation2 + $0x10] sm:$0xff] %vm298_vm0, %v297_v11  ;;  %610 = vmatprep.subr.bf16.mxu0 %v686_v1  ;;  %640 = vmatprep.subr.bf16.mxu1 %v686_v1 }
  0x14   : > { %612 = vmatpush1.bf16.msra.mxu0 %v611_v16  ;;  %652 = vmatpush1.bf16.msra.mxu1 %v611_v16 }
  0x15   : > { %613 = vmatprep.subr.bf16.mxu0 %v686_v1  ;;  %641 = vmatprep.subr.bf16.mxu1 %v686_v1 }
  0x18   : > { %v788_v20 = vld [vmem:[#allocation2 + $0x8] sm:$0xff]  ;;  %v790_v21 = vld [vmem:[#allocation2 + $0x10] sm:$0xff]  ;;  %615 = vmatpush1.bf16.msra.mxu0 %v614_v26  ;;  %653 = vmatpush1.bf16.msra.mxu1 %v614_v26 }
  0x19   : > { %v312_v22 = vrot.slane %v788_v20, 1  ;;  %v313_v23 = vrot.slane %v790_v21, 1  ;;  %v326_v24 = vrot.slane %v788_v20, 2  ;;  %v327_v25 = vrot.slane %v790_v21, 2  ;;  %616 = vmatprep.subr.bf16.mxu0 %v686_v1  ;;  %642 = vmatprep.subr.bf16.mxu1 %v686_v1 }
  0x1b   : > { %v314_v27 = vsel %vm311_vm1, %v312_v22, %v313_v23  ;;  %v328_v30 = vsel %vm325_vm2, %v326_v24, %v327_v25  ;;  %v372_v31 = vrot.slane %v326_v24, 7  ;;  %v330_v32 = vsel %vm325_vm2, %v327_v25, %v329_v19 }
  0x1c   : > { %v672_v33 = vpack.i.bf16 %v314_v27, %v312_v22  ;;  %v373_v34 = vrot.slane %v328_v30, 7  ;;  %v377_v35 = vrot.slane %v330_v32, 7  ;;  %618 = vmatpush1.bf16.msra.mxu0 %v617_v36  ;;  %654 = vmatpush1.bf16.msra.mxu1 %v617_v36 }
  0x1d   : > { %619 = vmatprep.subr.bf16.mxu0 %v686_v1  ;;  %643 = vmatprep.subr.bf16.mxu1 %v686_v1 }
  0x1e   : > { %673 = vrot.lane.b32.xlu0 %v672_v33, %s687_s29  ;;  %v374_v37 = vsel %vm368_vm3, %v372_v31, %v373_v34  ;;  %v378_v38 = vsel %vm368_vm3, %v373_v34, %v377_v35 }
  0x1f   : > { %595 = vmatprep.mubr.msk.f32.mxu0 %vm298_vm0, %v374_v37  ;;  %596 = vmatprep.mubr.msk.f32.mxu1 %vm298_vm0, %v378_v38 }
  0x20   : > { %621 = vmatpush1.bf16.msra.mxu0 %v620_v41  ;;  %655 = vmatpush1.bf16.msra.mxu1 %v620_v41 }
  0x21   : > { %622 = vmatprep.subr.bf16.mxu0 %v686_v1  ;;  %644 = vmatprep.subr.bf16.mxu1 %v686_v1 }
  0x22   : > { %319 = vrot.lane.b32.xlu0 %v313_v23, %s687_s29 }
  0x24   : > { %624 = vmatpush1.bf16.msra.mxu0 %v623_v44  ;;  %656 = vmatpush1.bf16.msra.mxu1 %v623_v44 }
  0x25   : > { %625 = vmatprep.subr.bf16.mxu0 %v686_v1  ;;  %645 = vmatprep.subr.bf16.mxu1 %v686_v1 }
  0x28   : > { %627 = vmatpush1.bf16.msra.mxu0 %v626_v47  ;;  %657 = vmatpush1.bf16.msra.mxu1 %v626_v47 }
  0x29   : > { %628 = vmatprep.subr.bf16.mxu0 %v686_v1  ;;  %646 = vmatprep.subr.bf16.mxu1 %v686_v1 }
  0x2c   : > { %630 = vmatpush1.bf16.msra.mxu0 %v629_v50  ;;  %658 = vmatpush1.bf16.msra.mxu1 %v629_v50 }
  0x2d   : > { %631 = vmatprep.subr.bf16.mxu0 %v686_v1  ;;  %647 = vmatprep.subr.bf16.mxu1 %v686_v1 }
  0x30   : > { %633 = vmatpush1.bf16.msra.mxu0 %v632_v53  ;;  %659 = vmatpush1.bf16.msra.mxu1 %v632_v53 }
  0x31   : > { %634 = vmatprep.subr.bf16.mxu0 %v686_v1  ;;  %648 = vmatprep.subr.bf16.mxu1 %v686_v1 }
  0x34   : > { %636 = vmatpush1.bf16.msra.mxu0 %v635_v56  ;;  %660 = vmatpush1.bf16.msra.mxu1 %v635_v56 }
  0x90   : > { %v674_v58 = vpop.permute.xlu0 %673 }
  0x91   : > { %v676_v59 = vunpack.i.h.bf16 %v674_v58  ;;  %v675_v60 = vunpack.i.l.bf16 %v674_v58 }
  0x93   : > { %v332_v61 = vsel %vm298_vm0, %v788_v20, %v676_v59  ;;  %v331_v62 = vsel %vm298_vm0, %v305_v57, %v675_v60 }
  0x94   : > { %v320_v63 = vpop.permute.xlu0 %319  ;;  %v369_v0 = vrot.slane %v331_v62, 7  ;;  %v370_v2 = vrot.slane %v332_v61, 7 }
  0x95   : > { %v333_v3 = vsel %vm298_vm0, %v790_v21, %v320_v63 }
  0x96   : > { %v375_v4 = vrot.slane %v333_v3, 7  ;;  %v371_v1 = vsel %vm368_vm3, %v369_v0, %v370_v2 }
  0x97   : > { %450 = vmatmul.mubr.f32.vlgmr.msra.gmra.mrb[0].mxu0 %v371_v1 }
  0x98   : > { %v376_v5 = vsel %vm368_vm3, %v370_v2, %v375_v4 }
  0x99   : > { %455 = vmatmul.mubr.f32.vlgmr.msra.gmra.mrb[0].mxu1 %v376_v5 }
 0x16a   : > { %v451_v7 = vpop.f32.mrb[0].mxu0 }
 0x16b   : > { %v452_v8 = vadd.f32 %v594_v6, %v451_v7  ;;  %v453_v9 = vpop.f32.mrb[1].mxu0 }
 0x16c   : > { %v456_v10 = vpop.f32.mrb[0].mxu1 }
 0x16d   : > { %460 = vst [vmem:[%s289_s14] sm:$0xff] %v452_v8  ;;  %v457_v11 = vadd.f32 %v594_v6, %v456_v10  ;;  %v458_v12 = vpop.f32.mrb[1].mxu1  ;;  %v470_v13 = vmul.f32 %v452_v8, %v452_v8 }
 0x16f   : > { %461 = vst [vmem:[%s289_s14 + $0x8] sm:$0xff] %v457_v11  ;;  %v462_v14 = vadd.f32 %v457_v11, %v452_v8  ;;  %v471_v15 = vmul.f32 %v457_v11, %v457_v11 }
 0x171   : > { %v463_v16 = vrot.slane %v462_v14, 4  ;;  %v472_v17 = vadd.f32 %v471_v15, %v470_v13 }
 0x173   : > { %v464_v18 = vadd.f32 %v463_v16, %v462_v14  ;;  %v473_v19 = vrot.slane %v472_v17, 4 }
 0x175   : > { %v465_v20 = vrot.slane %v464_v18, 2  ;;  %v474_v21 = vadd.f32 %v473_v19, %v472_v17 }
 0x177   : > { %v466_v22 = vadd.f32 %v465_v20, %v464_v18  ;;  %v475_v23 = vrot.slane %v474_v21, 2 }
 0x179   : > { %v467_v24 = vrot.slane %v466_v22, 1  ;;  %v476_v25 = vadd.f32 %v475_v23, %v474_v21 }
 0x17b   : > { %v468_v26 = vadd.f32 %v467_v24, %v466_v22  ;;  %v477_v27 = vrot.slane %v476_v25, 1 }
 0x17d   : > { %469 = vst [vmem:[%s292_s16] sm:$0x1] %v468_v26  ;;  %v478_v28 = vadd.f32 %v477_v27, %v476_v25 }
 0x17f   : > { %479 = vst [vmem:[%s295_s19] sm:$0x1] %v478_v28 }
 0x180 PF: > { %s18_s24 = sadd.s32 1, %s683_s24  }
 0x181   : > { %p15_p4 = scmp.ge.s32.totalorder %s18_s24, 4  }
 0x183   :  { %17 = sbr.rel (!%p15_p4) target bundleno = 1 (0x1), region = 94 }

// kernel: conv_block_forward.5
= control target key start
LH: loop header
LB: loop body
LE: loop exit
PB: predicated region body
PF: predicated region fallthrough
CT: control target
= control target key end

     0   :  { %s301_s12 = smov 0   ;;  %s318_s0 = inlined_call_operand.vmem [shape: f32[2,16,128], index: 0, kind: input, shape index: {}]   ;;  %s319_s1 = inlined_call_operand.vmem [shape: f32[1,128], index: 1, kind: input, shape index: {}]   ;;  %s320_s2 = inlined_call_operand.vmem [shape: f32[1,128], index: 2, kind: input, shape index: {}]   ;;  %s321_s3 = inlined_call_operand.vmem [shape: f32[2,16,128], index: 3, kind: output, shape index: {}]  }
   0x1 LB: > { %s250_s13 = sadd.s32 4294967295, %s279_s12   ;;  %p254_p0 = scmp.ge.s32.totalorder %s279_s12, 1  ;;  %s279_s12 = sphi %s301_s12, %s13_s12  }
   0x2   : > { %p137_p1 = scmp.lt.s32.totalorder %s279_s12, 3 }
   0x4   : > { %p138_p2 = pnand %p254_p0, %p137_p1 }
   0x5   : > { %p161_p3 = scmp.lt.s32.totalorder (!%p138_p2), %s250_s13, 1  ;;  %v259_v0 = vld [vmem:[%s319_s1] ss:$0 sm:$0xff] (!%p138_p2) }
   0x6   : > { %141 = sbr.rel (%p138_p2) target bundleno = 24 (0x18), region = 32  ;;  %v260_v3 = vld [vmem:[%s320_s2] ss:$0 sm:$0xff] (!%p138_p2) }
   0xd   : > { %s323_s13 = smov (!%p161_p3, %s250_s13), 1 }
   0xe   : > { %s263_s14 = sshll.u32 %s323_s13, 4 }
   0xf   : > { %s165_s19 = scalar_lea.vmem %s318_s0, %s263_s14  ;;  %s170_s24 = scalar_lea.vmem %s321_s3, %s263_s14 }
  0x10   : > { %v171_v1 = vld [vmem:[%s165_s19] sm:$0xff]  ;;  %v172_v2 = vld [vmem:[%s165_s19 + $0x8] sm:$0xff] }
  0x11   : > { %v180_v4 = vmul.f32 %v259_v0, %v171_v1  ;;  %v181_v5 = vmul.f32 %v259_v0, %v172_v2 }
  0x13   : > { %v189_v6 = vadd.f32 %v260_v3, %v180_v4  ;;  %v190_v7 = vadd.f32 %v260_v3, %v181_v5 }
  0x15   : > { %v191_v8 = vmax.f32 %v189_v6, 0.0  ;;  %v192_v9 = vmax.f32 %v190_v7, 0.0 }
  0x17   : > { %193 = vst [vmem:[%s170_s24] sm:$0xff] %v191_v8  ;;  %194 = vst [vmem:[%s170_s24 + $0x8] sm:$0xff] %v192_v9 }
  0x18 PF: > { %s13_s12 = sadd.s32 1, %s279_s12  }
  0x19   : > { %p10_p4 = scmp.ge.s32.totalorder %s13_s12, 4  }
  0x1b   :  { %12 = sbr.rel (!%p10_p4) target bundleno = 1 (0x1), region = 62 }

// kernel: conv_block_forward.4
= control target key start
LH: loop header
LB: loop body
LE: loop exit
PB: predicated region body
PF: predicated region fallthrough
CT: control target
= control target key end

     0   :  { %s923_s24 = smov 0   ;;  %s1127_s0 = inlined_call_operand.vmem [shape: f32[2,16,128], index: 0, kind: input, shape index: {}]   ;;  %s1128_s1 = inlined_call_operand.vmem [shape: f32[1,128], index: 1, kind: input, shape index: {}]   ;;  %s1129_s2 = inlined_call_operand.vmem [shape: f32[1,128], index: 2, kind: input, shape index: {}]   ;;  %s1130_s3 = inlined_call_operand.vmem [shape: f32[384,128], index: 3, kind: input, shape index: {}]   ;;  %s1131_s4 = inlined_call_operand.vmem [shape: f32[1,128], index: 4, kind: input, shape index: {}]   ;;  %s1132_s5 = inlined_call_operand.vmem [shape: f32[2,16,128], index: 5, kind: output, shape index: {0}]   ;;  %s1133_s6 = inlined_call_operand.vmem [shape: f32[2,1,128], index: 6, kind: output, shape index: {1}]   ;;  %s1134_s7 = inlined_call_operand.vmem [shape: f32[2,1,128], index: 7, kind: output, shape index: {2}]  }
   0x1 LB: > { %s694_s25 = sadd.s32 4294967295, %s880_s24   ;;  %p698_p0 = scmp.ge.s32.totalorder %s880_s24, 1  ;;  %s880_s24 = sphi %s923_s24, %s18_s24  }
   0x2   : > { %p242_p1 = scmp.lt.s32.totalorder %s880_s24, 3 }
   0x4   : > { %p243_p2 = pnand %p698_p0, %p242_p1 }
   0x5   : > { %v357_v0 = vld [vmem:[%s1130_s3 + $0x80] sm:$0xff] (!%p243_p2)  ;;  %v358_v1 = vld [vmem:[%s1130_s3 + $0x88] sm:$0xff] (!%p243_p2)  ;;  %v359_v5 = vld [vmem:[%s1130_s3 + $0x90] sm:$0xff] (!%p243_p2)  ;;  %p951_p3 = scmp.lt.s32.totalorder (!%p243_p2), %s694_s25, 1  ;;  %vm330_vm0 = vcmask (!%p243_p2), 1046528   ;;  %vm335_vm1 = vcmask (!%p243_p2), 1045504  }
   0x6   : > { %246 = sbr.rel (%p243_p2) target bundleno = 280 (0x118), region = 40  ;;  %v341_v2 = vld [vmem:[%s1130_s3] sm:$0xff] (!%p243_p2)  ;;  %v801_v3 = vpack.c.bf16 (!%p243_p2), %v358_v1, %v357_v0  ;;  %v342_v4 = vld [vmem:[%s1130_s3 + $0x8] sm:$0xff] (!%p243_p2)  ;;  %v360_v6 = vld [vmem:[%s1130_s3 + $0x98] sm:$0xff] (!%p243_p2)  ;;  %vm397_vm2 = vcmask (!%p243_p2), 1040384  }
   0x7   : > { %v803_v7 = vpack.c.bf16 (!%p243_p2), %v342_v4, %v341_v2  ;;  %v805_v8 = vpack.c.bf16 (!%p243_p2), %v360_v6, %v359_v5  ;;  %v373_v9 = vld [vmem:[%s1130_s3 + $0x100] sm:$0xff] (!%p243_p2)  ;;  %v374_v10 = vld [vmem:[%s1130_s3 + $0x108] sm:$0xff] (!%p243_p2)  ;;  %v343_v11 = vld [vmem:[%s1130_s3 + $0x10] sm:$0xff] (!%p243_p2) }
   0x8   : > { %802 = vmatprep.subr.bf16.mxu0 (!%p243_p2), %v801_v3  ;;  %v833_v12 = vpack.c.bf16 (!%p243_p2), %v374_v10, %v373_v9  ;;  %v344_v13 = vld [vmem:[%s1130_s3 + $0x18] sm:$0xff] (!%p243_p2)  ;;  %v361_v14 = vld [vmem:[%s1130_s3 + $0xa0] sm:$0xff] (!%p243_p2)  ;;  %v362_v15 = vld [vmem:[%s1130_s3 + $0xa8] sm:$0xff] (!%p243_p2)  ;;  %v882_v9 = vmov (!%p243_p2), 0.0  }
   0x9   : > { %804 = vmatpush3.bf16.msra.mxu0 (!%p243_p2), %v803_v7  ;;  %v807_v16 = vpack.c.bf16 (!%p243_p2), %v344_v13, %v343_v11  ;;  %v375_v17 = vld [vmem:[%s1130_s3 + $0x110] sm:$0xff] (!%p243_p2)  ;;  %v376_v18 = vld [vmem:[%s1130_s3 + $0x118] sm:$0xff] (!%p243_p2)  ;;  %v809_v19 = vpack.c.bf16 (!%p243_p2), %v362_v15, %v361_v14  ;;  %v345_v21 = vld [vmem:[%s1130_s3 + $0x20] sm:$0xff] (!%p243_p2)  ;;  %v339_v10 = vrot.slane (!%p243_p2), %v882_v9, 2 }
   0xa   : > { %806 = vmatprep.subr.bf16.mxu0 (!%p243_p2), %v805_v8  ;;  %834 = vmatprep.subr.bf16.mxu1 (!%p243_p2), %v833_v12  ;;  %v837_v20 = vpack.c.bf16 (!%p243_p2), %v376_v18, %v375_v17  ;;  %v346_v22 = vld [vmem:[%s1130_s3 + $0x28] sm:$0xff] (!%p243_p2)  ;;  %v363_v23 = vld [vmem:[%s1130_s3 + $0xb0] sm:$0xff] (!%p243_p2)  ;;  %v364_v24 = vld [vmem:[%s1130_s3 + $0xb8] sm:$0xff] (!%p243_p2) }
   0xb   : > { %836 = vmatpush3.bf16.msra.mxu1 (!%p243_p2), %v833_v12  ;;  %v377_v25 = vld [vmem:[%s1130_s3 + $0x120] sm:$0xff] (!%p243_p2)  ;;  %v378_v26 = vld [vmem:[%s1130_s3 + $0x128] sm:$0xff] (!%p243_p2)  ;;  %v811_v28 = vpack.c.bf16 (!%p243_p2), %v346_v22, %v345_v21  ;;  %v379_v29 = vld [vmem:[%s1130_s3 + $0x130] sm:$0xff] (!%p243_p2)  ;;  %v813_v31 = vpack.c.bf16 (!%p243_p2), %v364_v24, %v363_v23 }
   0xc   : > { %838 = vmatprep.subr.bf16.mxu1 (!%p243_p2), %v837_v20  ;;  %v841_v27 = vpack.c.bf16 (!%p243_p2), %v378_v26, %v377_v25  ;;  %v380_v30 = vld [vmem:[%s1130_s3 + $0x138] sm:$0xff] (!%p243_p2)  ;;  %v347_v32 = vld [vmem:[%s1130_s3 + $0x30] sm:$0xff] (!%p243_p2)  ;;  %v365_v34 = vld [vmem:[%s1130_s3 + $0xc0] sm:$0xff] (!%p243_p2) }
   0xd   : > { %s1137_s25 = smov (!%p951_p3, %s694_s25), 1  ;;  %808 = vmatpush3.bf16.msra.mxu0 %v807_v16  ;;  %v348_v33 = vld [vmem:[%s1130_s3 + $0x38] sm:$0xff]  ;;  %v366_v35 = vld [vmem:[%s1130_s3 + $0xc8] sm:$0xff]  ;;  %v845_v36 = vpack.c.bf16 %v380_v30, %v379_v29  ;;  %v381_v38 = vld [vmem:[%s1130_s3 + $0x140] sm:$0xff] }
   0xe   : > { %810 = vmatprep.subr.bf16.mxu0 %v809_v19  ;;  %s708_s10 = sshll.u32 %s1137_s25, 4  ;;  %v815_v37 = vpack.c.bf16 %v348_v33, %v347_v32  ;;  %v382_v39 = vld [vmem:[%s1130_s3 + $0x148] sm:$0xff]  ;;  %v817_v40 = vpack.c.bf16 %v366_v35, %v365_v34  ;;  %v349_v41 = vld [vmem:[%s1130_s3 + $0x40] sm:$0xff]  ;;  %v367_v43 = vld [vmem:[%s1130_s3 + $0xd0] sm:$0xff]  ;;  %v398_v32 = vrot.slane %v882_v9, 7  ;;  %s292_s12 = scalar_lea.vmem %s1133_s6, %s1137_s25 }
   0xf   : > { %840 = vmatpush3.bf16.msra.mxu1 %v837_v20  ;;  %s284_s22 = scalar_lea.vmem %s1127_s0, %s708_s10  ;;  %v350_v42 = vld [vmem:[%s1130_s3 + $0x48] sm:$0xff]  ;;  %v368_v44 = vld [vmem:[%s1130_s3 + $0xd8] sm:$0xff]  ;;  %v849_v45 = vpack.c.bf16 %v382_v39, %v381_v38  ;;  %v383_v46 = vld [vmem:[%s1130_s3 + $0x150] sm:$0xff]  ;;  %s289_s9 = scalar_lea.vmem %s1132_s5, %s708_s10 }
  0x10   : > { %842 = vmatprep.subr.bf16.mxu1 %v841_v27  ;;  %v296_v47 = vld [vmem:[%s284_s22] sm:$0xff]  ;;  %v297_v48 = vld [vmem:[%s284_s22 + $0x8] sm:$0xff]  ;;  %v819_v49 = vpack.c.bf16 %v350_v42, %v349_v41  ;;  %v384_v50 = vld [vmem:[%s1130_s3 + $0x158] sm:$0xff]  ;;  %v821_v53 = vpack.c.bf16 %v368_v44, %v367_v43  ;;  %s295_s16 = scalar_lea.vmem %s1134_s7, %s1137_s25 }
  0x11   : > { %812 = vmatpush3.bf16.msra.mxu0 %v811_v28  ;;  %v703_v51 = vld [vmem:[%s1128_s1] ss:$0 sm:$0xff]  ;;  %v351_v54 = vld [vmem:[%s1130_s3 + $0x50] sm:$0xff]  ;;  %v352_v55 = vld [vmem:[%s1130_s3 + $0x58] sm:$0xff]  ;;  %v853_v60 = vpack.c.bf16 %v384_v50, %v383_v46 }
  0x12   : > { %814 = vmatprep.subr.bf16.mxu0 %v813_v31  ;;  %v704_v52 = vld [vmem:[%s1129_s2] ss:$0 sm:$0xff]  ;;  %v305_v56 = vmul.f32 %v703_v51, %v296_v47  ;;  %v306_v57 = vmul.f32 %v703_v51, %v297_v48  ;;  %v370_v59 = vld [vmem:[%s1130_s3 + $0xe8] sm:$0xff]  ;;  %v823_v63 = vpack.c.bf16 %v352_v55, %v351_v54  ;;  %v371_v7 = vld [vmem:[%s1130_s3 + $0xf0] sm:$0xff] }
  0x13   : > { %844 = vmatpush3.bf16.msra.mxu1 %v841_v27  ;;  %v369_v58 = vld [vmem:[%s1130_s3 + $0xe0] sm:$0xff]  ;;  %v386_v1 = vld [vmem:[%s1130_s3 + $0x168] sm:$0xff]  ;;  %v372_v8 = vld [vmem:[%s1130_s3 + $0xf8] sm:$0xff] }
  0x14   : > { %846 = vmatprep.subr.bf16.mxu1 %v845_v36  ;;  %v314_v61 = vadd.f32 %v704_v52, %v305_v56  ;;  %v315_v62 = vadd.f32 %v704_v52, %v306_v57  ;;  %v385_v0 = vld [vmem:[%s1130_s3 + $0x160] sm:$0xff]  ;;  %v825_v2 = vpack.c.bf16 %v370_v59, %v369_v58  ;;  %v354_v4 = vld [vmem:[%s1130_s3 + $0x68] sm:$0xff]  ;;  %v387_v16 = vld [vmem:[%s1130_s3 + $0x170] sm:$0xff]  ;;  %v829_v19 = vpack.c.bf16 %v372_v8, %v371_v7 }
  0x15   : > { %816 = vmatpush3.bf16.msra.mxu0 %v815_v37  ;;  %v353_v3 = vld [vmem:[%s1130_s3 + $0x60] sm:$0xff]  ;;  %v857_v11 = vpack.c.bf16 %v386_v1, %v385_v0  ;;  %v388_v17 = vld [vmem:[%s1130_s3 + $0x178] sm:$0xff]  ;;  %v355_v20 = vld [vmem:[%s1130_s3 + $0x70] sm:$0xff] }
  0x16   : > { %818 = vmatprep.subr.bf16.mxu0 %v817_v40  ;;  %v316_v5 = vmax.f32 %v314_v61, 0.0  ;;  %v317_v6 = vmax.f32 %v315_v62, 0.0  ;;  %v827_v15 = vpack.c.bf16 %v354_v4, %v353_v3  ;;  %v356_v21 = vld [vmem:[%s1130_s3 + $0x78] sm:$0xff]  ;;  %v861_v27 = vpack.c.bf16 %v388_v17, %v387_v16  ;;  %v705_v44 = vld [vmem:[%s1131_s4] ss:$0 sm:$0xff] }
  0x17   : > { %848 = vmatpush3.bf16.msra.mxu1 %v845_v36  ;;  %v831_v30 = vpack.c.bf16 %v356_v21, %v355_v20 }
  0x18   : > { %850 = vmatprep.subr.bf16.mxu1 %v849_v45  ;;  %v331_v12 = vrot.slane %v316_v5, 1  ;;  %v332_v13 = vrot.slane %v317_v6, 1  ;;  %v336_v14 = vrot.slane %v316_v5, 2  ;;  %v337_v18 = vrot.slane %v317_v6, 2 }
  0x19   : > { %820 = vmatpush3.bf16.msra.mxu0 %v819_v49  ;;  %v399_v33 = vrot.slane %v316_v5, 7  ;;  %v407_v38 = vrot.slane %v317_v6, 7 }
  0x1a   : > { %822 = vmatprep.subr.bf16.mxu0 %v821_v53  ;;  %v333_v22 = vsel %vm330_vm0, %v331_v12, %v332_v13  ;;  %v401_v23 = vrot.slane %v331_v12, 7  ;;  %v338_v25 = vsel %vm335_vm1, %v336_v14, %v337_v18  ;;  %v404_v26 = vrot.slane %v336_v14, 7 }
  0x1b   : > { %852 = vmatpush3.bf16.msra.mxu1 %v849_v45  ;;  %v402_v24 = vrot.slane %v333_v22, 7  ;;  %v405_v28 = vrot.slane %v338_v25, 7  ;;  %v340_v29 = vsel %vm335_vm1, %v337_v18, %v339_v10  ;;  %v409_v34 = vrot.slane %v332_v13, 7 }
  0x1c   : > { %854 = vmatprep.subr.bf16.mxu1 %v853_v60  ;;  %v411_v36 = vrot.slane %v340_v29, 7  ;;  %v400_v37 = vsel %vm397_vm2, %v398_v32, %v399_v33  ;;  %v408_v41 = vsel %vm397_vm2, %v399_v33, %v407_v38 }
  0x1d   : > { %824 = vmatpush3.bf16.msra.mxu0 %v823_v63  ;;  %v403_v31 = vsel %vm397_vm2, %v401_v23, %v402_v24  ;;  %v406_v35 = vsel %vm397_vm2, %v404_v26, %v405_v28  ;;  %v410_v39 = vsel %vm397_vm2, %v402_v24, %v409_v34 }
  0x1e   : > { %826 = vmatprep.subr.bf16.mxu0 %v825_v2  ;;  %483 = vmatprep.mubr.f32.mxu0 %v403_v31  ;;  %v412_v40 = vsel %vm397_vm2, %v405_v28, %v411_v36 }
  0x1f   : > { %856 = vmatpush3.bf16.msra.mxu1 %v853_v60  ;;  %798 = vmatprep.mubr.f32.mxu1 %v406_v35 }
  0x20   : > { %858 = vmatprep.subr.bf16.mxu1 %v857_v11 }
  0x21   : > { %828 = vmatpush3.bf16.msra.mxu0 %v827_v15 }
  0x22   : > { %830 = vmatprep.subr.bf16.mxu0 %v829_v19 }
  0x23   : > { %860 = vmatpush3.bf16.msra.mxu1 %v857_v11 }
  0x24   : > { %862 = vmatprep.subr.bf16.mxu1 %v861_v27 }
  0x25   : > { %832 = vmatpush3.bf16.msra.mxu0 %v831_v30 }
  0x27   : > { %864 = vmatpush3.bf16.msra.mxu1 %v861_v27 }
  0x28   : > { %484 = vmatmul.mubr.f32.vlgmr.msra.gmra.mrb[0].mxu0 %v400_v37 }
  0x29   : > { %488 = vmatprep.mubr.f32.mxu0 %v410_v39 }
  0x2a   : > { %799 = vmatmul.mubr.f32.vlgmr.msra.gmra.mrb[0].mxu1 %v412_v40 }
  0x2c   : > { %489 = vmatmul.mubr.f32.gmra.mrb[2].mxu0 %v408_v41 }
  0xfb   : > { %v742_v42 = vpop.f32.mrb[0].mxu0 }
  0xfc   : > { %v743_v43 = vpop.f32.mrb[1].mxu0 }
  0xfd   : > { %v744_v45 = vadd.f32 %v743_v43, %v742_v42  ;;  %v800_v46 = vpop.f32.mrb[0].mxu1 }
  0xfe   : > { %v560_v47 = vpop.f32.mrb[1].mxu1 }
  0xff   : > { %v745_v48 = vpop.f32.mrb[2].mxu0  ;;  %v486_v49 = vadd.f32 %v744_v45, %v705_v44 }
 0x100   : > { %v746_v50 = vpop.f32.mrb[3].mxu0 }
 0x101   : > { %v747_v51 = vadd.f32 %v746_v50, %v745_v48  ;;  %v561_v52 = vadd.f32 %v560_v47, %v486_v49 }
 0x103   : > { %v491_v53 = vadd.f32 %v747_v51, %v705_v44  ;;  %569 = vst [vmem:[%s289_s9] sm:$0xff] %v561_v52  ;;  %v579_v56 = vmul.f32 %v561_v52, %v561_v52 }
 0x105   : > { %v566_v54 = vadd.f32 %v800_v46, %v491_v53 }
 0x107   : > { %570 = vst [vmem:[%s289_s9 + $0x8] sm:$0xff] %v566_v54  ;;  %v571_v55 = vadd.f32 %v566_v54, %v561_v52  ;;  %v580_v57 = vmul.f32 %v566_v54, %v566_v54 }
 0x109   : > { %v572_v58 = vrot.slane %v571_v55, 4  ;;  %v581_v59 = vadd.f32 %v580_v57, %v579_v56 }
 0x10b   : > { %v573_v60 = vadd.f32 %v572_v58, %v571_v55  ;;  %v582_v61 = vrot.slane %v581_v59, 4 }
 0x10d   : > { %v574_v62 = vrot.slane %v573_v60, 2  ;;  %v583_v63 = vadd.f32 %v582_v61, %v581_v59 }
 0x10f   : > { %v575_v0 = vadd.f32 %v574_v62, %v573_v60  ;;  %v584_v1 = vrot.slane %v583_v63, 2 }
 0x111   : > { %v576_v2 = vrot.slane %v575_v0, 1  ;;  %v585_v3 = vadd.f32 %v584_v1, %v583_v63 }
 0x113   : > { %v577_v4 = vadd.f32 %v576_v2, %v575_v0  ;;  %v586_v5 = vrot.slane %v585_v3, 1 }
 0x115   : > { %578 = vst [vmem:[%s292_s12] sm:$0x1] %v577_v4  ;;  %v587_v6 = vadd.f32 %v586_v5, %v585_v3 }
 0x117   : > { %588 = vst [vmem:[%s295_s16] sm:$0x1] %v587_v6 }
 0x118 PF: > { %s18_s24 = sadd.s32 1, %s880_s24  }
 0x119   : > { %p15_p4 = scmp.ge.s32.totalorder %s18_s24, 4  }
 0x11b   :  { %17 = sbr.rel (!%p15_p4) target bundleno = 1 (0x1), region = 94 }

</bundles_post_ra>
